<compile_context>
chip_gen: v5e
topology: v5e:2x2
jax: 0.10.0
libtpu: 0.0.40
codegen_flags: <defaults>
</compile_context>

<pallas_src>
import jax
import jax.numpy as jnp
from jax.experimental import pallas as pl
from jax.experimental.pallas import tpu as pltpu

LANE = 128
ROW = 16          # bf16 sublane-pack granularity (safe on all generations)
MAX_TB = 1024     # batch-tile cap: ~7 MiB double-buffered footprint with bf16 x


def _round_up(x, m):
    return ((x + m - 1) // m) * m


def _fc_kernel(x_ref, wt_ref, b_ref, o_ref):
    # x_ref:  (TB, K)      bf16 in VMEM (batch-tiled, double-buffered stream)
    # wt_ref: (K, N_pad)   bf16 in VMEM (grid-invariant: index_map -> (0, 0))
    # b_ref:  (1, N_pad)   f32  in VMEM (grid-invariant)
    # o_ref:  (TB, N_pad)  f32  in VMEM (lane-dense, unmasked stores)
    acc = jnp.dot(x_ref[...], wt_ref[...], preferred_element_type=jnp.float32)
    o_ref[...] = (acc + b_ref[...]).astype(o_ref.dtype)


def prepare_effnet_fc_params(weight, bias):
    """One-time parameter prep (hoisted out of the per-call forward path).

    weight: (numClass, K) float32  (PyTorch nn.Linear layout)
    bias:   (numClass,)   float32
    returns (wt (K, N_pad) bf16, bias (1, N_pad) f32, numClass)
    Padded columns are zero, so they contribute nothing and are sliced away.
    """
    num_class, K = weight.shape
    assert bias.shape == (num_class,)
    n_pad = _round_up(num_class, LANE)
    wt = jnp.zeros((K, n_pad), jnp.bfloat16).at[:, :num_class].set(
        weight.T.astype(jnp.bfloat16))
    b2 = jnp.zeros((1, n_pad), jnp.float32).at[0, :num_class].set(
        bias.astype(jnp.float32))
    return wt, b2, num_class


def effnet_fc_forward(x, wt, b2, num_class):
    """Pallas equivalent of EffNetFC.forward.

    x:   (B, ...) with prod(...) == 1280   (nn.Flatten is a reshape here)
    wt:  (1280, N_pad) bf16   pre-transposed, zero-padded weight
    b2:  (1, N_pad)    f32    zero-padded bias
    returns (B, num_class) float32
    """
    B = x.shape[0]
    K, n_pad = wt.shape
    assert b2.shape == (1, n_pad)

    # nn.Flatten + bf16 cast of the dominant HBM stream.  (In a full model the
    # upstream EfficientNet features would already arrive in bf16, making the
    # cast free; here it is an explicit wrapper op.)
    x2 = x.reshape(B, -1).astype(jnp.bfloat16)
    assert x2.shape[1] == K

    # --- batch tiling ----------------------------------------------------
    b_padr = _round_up(B, ROW)
    if b_padr <= 2 * ROW:
        steps = 1                                   # too small to split usefully
    else:
        # >= 2 grid steps so the "parallel" axis feeds both TCs on v7x,
        # while keeping each tile under MAX_TB rows.
        steps = max(2, pl.cdiv(b_padr, MAX_TB))
    tb = _round_up(pl.cdiv(b_padr, steps), ROW)     # <= MAX_TB by construction
    b_pad = steps * tb                              # pads < 16*steps rows total
    if b_pad != B:
        x2 = jnp.pad(x2, ((0, b_pad - B), (0, 0)))

    cost = pl.CostEstimate(
        flops=2 * b_pad * K * n_pad,
        transcendentals=0,
        bytes_accessed=(2 * b_pad * K          # bf16 x stream
                        + 2 * K * n_pad        # bf16 weight (resident)
                        + 4 * n_pad            # f32 bias
                        + 4 * b_pad * n_pad),  # f32 output
    )

    out = pl.pallas_call(
        _fc_kernel,
        out_shape=jax.ShapeDtypeStruct((b_pad, n_pad), jnp.float32),
        grid_spec=pl.GridSpec(
            grid=(steps,),
            in_specs=[
                pl.BlockSpec((tb, K), lambda i: (i, 0)),      # x: tiled over batch
                pl.BlockSpec((K, n_pad), lambda i: (0, 0)),   # wt: resident
                pl.BlockSpec((1, n_pad), lambda i: (0, 0)),   # bias: resident
            ],
            out_specs=pl.BlockSpec((tb, n_pad), lambda i: (i, 0)),
        ),
        compiler_params=pltpu.CompilerParams(
            dimension_semantics=("parallel",)),               # shard batch across TCs
        cost_estimate=cost,
    )(x2, wt, b2)

    return out[:B, :num_class]


if __name__ == "__main__":
    key = jax.random.PRNGKey(0)
    k_x, k_w, k_b = jax.random.split(key, 3)

    IN_FEATURES = 1280   # fixed by the module definition (Linear(1280, numClass))
    NUM_CLASS = 10
    B = 8

    # EfficientNet-style pooled feature map: (B, 1280, 1, 1) -> Flatten -> (B, 1280)
    x = jax.random.normal(k_x, (B, IN_FEATURES, 1, 1), dtype=jnp.float32)

    # Deterministic synthetic parameters (matching nn.Linear shapes / init bound).
    bound = 1.0 / (IN_FEATURES ** 0.5)
    weight = jax.random.uniform(
        k_w, (NUM_CLASS, IN_FEATURES), minval=-bound, maxval=bound,
        dtype=jnp.float32)
    bias = jax.random.uniform(
        k_b, (NUM_CLASS,), minval=-bound, maxval=bound, dtype=jnp.float32)

    # One-time param prep (transpose + lane padding + bf16), outside the forward path.
    wt, b2, nc = prepare_effnet_fc_params(weight, bias)

    y = effnet_fc_forward(x, wt, b2, nc)
    jax.block_until_ready(y)

    # Reference check against plain JAX (same semantics as Flatten + nn.Linear).
    # bf16 MXU inputs with f32 accumulation -> relax tolerance vs the f32 reference.
    y_ref = x.reshape(B, -1) @ weight.T + bias
    assert y.shape == (B, NUM_CLASS)
    assert jnp.allclose(y, y_ref, atol=2e-2, rtol=2e-2)

    # Also exercise the multi-tile + row-padding path (B=40 -> 2 grid steps, padded).
    B2 = 40
    x_b2 = jax.random.normal(jax.random.PRNGKey(1), (B2, IN_FEATURES, 1, 1),
                             dtype=jnp.float32)
    y2 = effnet_fc_forward(x_b2, wt, b2, nc)
    jax.block_until_ready(y2)
    y2_ref = x_b2.reshape(B2, -1) @ weight.T + bias
    assert y2.shape == (B2, NUM_CLASS)
    assert jnp.allclose(y2, y2_ref, atol=2e-2, rtol=2e-2)

    print("KERNEL_OK")
</pallas_src>

<mosaic_0001>
module attributes {stable_mosaic.version = 11 : i64} {
  func.func @_fc_kernel(%arg0: i32, %arg1: memref<16x1280xbf16, #tpu.memory_space<vmem>>, %arg2: memref<1280x128xbf16, #tpu.memory_space<vmem>>, %arg3: memref<1x128xf32, #tpu.memory_space<vmem>>, %arg4: memref<16x128xf32, #tpu.memory_space<vmem>>) attributes {dimension_semantics = [#tpu.dimension_semantics<parallel>], iteration_bounds = array<i64: 1>, scalar_prefetch = 0 : i64, scratch_operands = 0 : i64, tpu.core_type = #tpu.core_type<tc>, window_params = [{transform_indices = @transform_0, window_bounds = array<i64: 16, 1280>}, {pipeline_mode = #tpu.pipeline_mode<synchronous>, transform_indices = @transform_1, window_bounds = array<i64: 1280, 128>}, {pipeline_mode = #tpu.pipeline_mode<synchronous>, transform_indices = @transform_2, window_bounds = array<i64: 1, 128>}, {transform_indices = @transform_3, window_bounds = array<i64: 16, 128>}]} {
    %c0 = arith.constant 0 : index
    %c0_0 = arith.constant 0 : index
    %0 = vector.load %arg1[%c0, %c0_0] : memref<16x1280xbf16, #tpu.memory_space<vmem>>, vector<16x1280xbf16>
    %c0_1 = arith.constant 0 : index
    %c0_2 = arith.constant 0 : index
    %1 = vector.load %arg2[%c0_1, %c0_2] : memref<1280x128xbf16, #tpu.memory_space<vmem>>, vector<1280x128xbf16>
    %cst = arith.constant dense<0.000000e+00> : vector<16x128xf32>
    %2 = tpu.matmul %0, %1, %cst {dimension_numbers = #tpu.dot_dimension_numbers<[1], [0], [0], [1], [0, 0, 1, 1], [], []>} : vector<16x1280xbf16>, vector<1280x128xbf16>, vector<16x128xf32> -> vector<16x128xf32>
    %c0_3 = arith.constant 0 : index
    %c0_4 = arith.constant 0 : index
    %3 = vector.load %arg3[%c0_3, %c0_4] : memref<1x128xf32, #tpu.memory_space<vmem>>, vector<1x128xf32>
    %4 = vector.broadcast %3 : vector<1x128xf32> to vector<16x128xf32>
    %5 = arith.addf %2, %4 : vector<16x128xf32>
    %c0_5 = arith.constant 0 : index
    %c0_6 = arith.constant 0 : index
    %6 = vector.load %arg4[%c0_5, %c0_6] : memref<16x128xf32, #tpu.memory_space<vmem>>, vector<16x128xf32>
    tpu.vector_store %arg4[%c0_5, %c0_6], %5 {strides = array<i32>} : memref<16x128xf32, #tpu.memory_space<vmem>>, vector<16x128xf32>,
    return
  }
  func.func @transform_0(%arg0: i32) -> (i32, i32) {
    %c0_i32 = arith.constant 0 : i32
    %c0_i32_0 = arith.constant 0 : i32
    return %arg0, %c0_i32 : i32, i32
  }
  func.func @transform_1(%arg0: i32) -> (i32, i32) {
    %c0_i32 = arith.constant 0 : i32
    %c0_i32_0 = arith.constant 0 : i32
    %c0_i32_1 = arith.constant 0 : i32
    return %c0_i32, %c0_i32_0 : i32, i32
  }
  func.func @transform_2(%arg0: i32) -> (i32, i32) {
    %c0_i32 = arith.constant 0 : i32
    %c0_i32_0 = arith.constant 0 : i32
    %c0_i32_1 = arith.constant 0 : i32
    return %c0_i32, %c0_i32_0 : i32, i32
  }
  func.func @transform_3(%arg0: i32) -> (i32, i32) {
    %c0_i32 = arith.constant 0 : i32
    %c0_i32_0 = arith.constant 0 : i32
    return %arg0, %c0_i32 : i32, i32
  }
}

</mosaic_0001>

<bundles_post_ra>
// kernel: tpu_custom_call.1
= control target key start
LH: loop header
LB: loop body
LE: loop exit
PB: predicated region body
PF: predicated region fallthrough
CT: control target
= control target key end

     0   :  { %8 = vsyncpa [#allocation3], 0  ;;  %s1492_s0 = inlined_call_operand.hbm [shape: bf16[16,1280], index: 0, kind: input, shape index: {}]   ;;  %s1493_s1 = inlined_call_operand.hbm [shape: bf16[1280,128], index: 1, kind: input, shape index: {}]   ;;  %s1494_s2 = inlined_call_operand.vmem [shape: f32[1,128], index: 2, kind: input, shape index: {}]   ;;  %s1495_s3 = inlined_call_operand.hbm [shape: f32[16,128], index: 3, kind: output, shape index: {}]  }
   0x1   :  { %9 = vsyncpa [#allocation6], 0 }
   0x2   :  { %10 = vsyncpa [#allocation4], 0  ;;  %s15_s14 = sshll.u32 %s1492_s0, 4  ;;  %s1451_s15 = smov [#allocation2]   ;;  %s16_s14 = int_to_ptr.hbm [resolvable:$true] %s15_s14 }
   0x3   :  { %s17_s16 = sshll.u32 %s1451_s15, 4  ;;  %s28_s19 = sshll.u32 %s1493_s1, 4  ;;  %s18_s16 = int_to_ptr.vmem [resolvable:$true] %s17_s16  ;;  %s29_s19 = int_to_ptr.hbm [resolvable:$true] %s28_s19 }
   0x4   :  { %s1452_s20 = smov 640   ;;  %s1453_s21 = smov 40  }
   0x5   :  { %23 = dma.hbm_to_vmem [thread:$0]  %s16_s14, 1280, %s18_s16, [#allocation3], %s1452_s20, %s1452_s20, %s1453_s21  }
   0x6   :  { %s1454_s22 = smov [#allocation5]   ;;  %s1455_s24 = smov 64  }
   0x7   :  { %s30_s23 = sshll.u32 %s1454_s22, 4  ;;  %s1456_s25 = smov 4   ;;  %s31_s23 = int_to_ptr.vmem [resolvable:$true] %s30_s23 }
   0x8   :  { %36 = dma.hbm_to_vmem [thread:$0]  %s29_s19, 10240, %s31_s23, [#allocation6], %s1455_s24, %s1455_s24, %s1456_s25  }
   0x9   :  { %1445 = dma.done.wait [#allocation3], 1280  }
   0xa   :  { %1446 = vsyncadd [#allocation3], 4294966016 }
   0xb   :  { %1447 = dma.done.wait [#allocation6], 10240  }
   0xc   :  { %1448 = vsyncadd [#allocation6], 4294957056  ;;  %v1290_v0 = vld [vmem:[#allocation5 + $0x38] sm:$0xff]  ;;  %v1289_v4 = vld [vmem:[#allocation5 + $0x30] sm:$0xff]  ;;  %s899_s29 = sshll.u32 %s1495_s3, 4  ;;  %s1458_s30 = smov 128   ;;  %s900_s29 = int_to_ptr.hbm [resolvable:$true] %s899_s29 }
   0xd   :  { %v1298_v1 = vld [vmem:[#allocation5 + $0x78] sm:$0xff]  ;;  %751 = vmatpush.bf16.msra.mxu0 %v1290_v0  ;;  %v1297_v5 = vld [vmem:[#allocation5 + $0x70] sm:$0xff]  ;;  %v1288_v8 = vld [vmem:[#allocation5 + $0x28] sm:$0xff]  ;;  %s1459_s4 = smov 8  }
   0xe   :  { %v1306_v2 = vld [vmem:[#allocation5 + $0xb8] sm:$0xff]  ;;  %765 = vmatpush.bf16.msra.mxu1 %v1298_v1  ;;  %v1305_v6 = vld [vmem:[#allocation5 + $0xb0] sm:$0xff]  ;;  %v1296_v9 = vld [vmem:[#allocation5 + $0x68] sm:$0xff] }
   0xf   :  { %v1314_v3 = vld [vmem:[#allocation5 + $0xf8] sm:$0xff]  ;;  %779 = vmatpush.bf16.msra.mxu2 %v1306_v2  ;;  %v1313_v7 = vld [vmem:[#allocation5 + $0xf0] sm:$0xff]  ;;  %v1304_v10 = vld [vmem:[#allocation5 + $0xa8] sm:$0xff] }
  0x10   :  { %793 = vmatpush.bf16.msra.mxu3 %v1314_v3  ;;  %v1312_v11 = vld [vmem:[#allocation5 + $0xe8] sm:$0xff]  ;;  %v1287_v12 = vld [vmem:[#allocation5 + $0x20] sm:$0xff]  ;;  %v1286_v16 = vld [vmem:[#allocation5 + $0x18] sm:$0xff] }
  0x11   :  { %752 = vmatpush.bf16.msra.mxu0 %v1289_v4  ;;  %v1295_v13 = vld [vmem:[#allocation5 + $0x60] sm:$0xff]  ;;  %v1294_v17 = vld [vmem:[#allocation5 + $0x58] sm:$0xff]  ;;  %v1285_v20 = vld [vmem:[#allocation5 + $0x10] sm:$0xff] }
  0x12   :  { %766 = vmatpush.bf16.msra.mxu1 %v1297_v5  ;;  %v1303_v14 = vld [vmem:[#allocation5 + $0xa0] sm:$0xff]  ;;  %v1302_v18 = vld [vmem:[#allocation5 + $0x98] sm:$0xff]  ;;  %v1293_v21 = vld [vmem:[#allocation5 + $0x50] sm:$0xff] }
  0x13   :  { %780 = vmatpush.bf16.msra.mxu2 %v1305_v6  ;;  %v1311_v15 = vld [vmem:[#allocation5 + $0xe0] sm:$0xff]  ;;  %v1310_v19 = vld [vmem:[#allocation5 + $0xd8] sm:$0xff]  ;;  %v1301_v22 = vld [vmem:[#allocation5 + $0x90] sm:$0xff] }
  0x14   :  { %794 = vmatpush.bf16.msra.mxu3 %v1313_v7  ;;  %v1309_v23 = vld [vmem:[#allocation5 + $0xd0] sm:$0xff]  ;;  %v1284_v24 = vld [vmem:[#allocation5 + $0x8] sm:$0xff]  ;;  %v1283_v28 = vld [vmem:[#allocation5] sm:$0xff] }
  0x15   :  { %753 = vmatpush.bf16.msra.mxu0 %v1288_v8  ;;  %v1292_v25 = vld [vmem:[#allocation5 + $0x48] sm:$0xff]  ;;  %v1291_v29 = vld [vmem:[#allocation5 + $0x40] sm:$0xff]  ;;  %v1322_v31 = vld [vmem:[#allocation5 + $0x138] sm:$0xff] }
  0x16   :  { %767 = vmatpush.bf16.msra.mxu1 %v1296_v9  ;;  %v1300_v26 = vld [vmem:[#allocation5 + $0x88] sm:$0xff]  ;;  %v1299_v30 = vld [vmem:[#allocation5 + $0x80] sm:$0xff]  ;;  %v915_v32 = vld [vmem:[#allocation2] sm:$0xf] }
  0x17   :  { %781 = vmatpush.bf16.msra.mxu2 %v1304_v10  ;;  %v1308_v27 = vld [vmem:[#allocation5 + $0xc8] sm:$0xff]  ;;  %v1278_v33 = vld [vmem:[#allocation2 + $0x24] sm:$0xf0]  ;;  %v1279_v36 = vld [vmem:[#allocation2 + $0x2c] sm:$0xf0] }
  0x18   :  { %795 = vmatpush.bf16.msra.mxu3 %v1312_v11  ;;  %v1330_v34 = vld [vmem:[#allocation5 + $0x178] sm:$0xff]  ;;  %v1273_v38 = vld [vmem:[#allocation2 + $0x4] sm:$0xf]  ;;  %v1307_v40 = vld [vmem:[#allocation5 + $0xc0] sm:$0xff]  ;;  %v916_v41 = vor.u32 %v1278_v33, %v915_v32 }
  0x19   :  { %754 = vmatpush.bf16.msra.mxu0 %v1287_v12  ;;  %v923_v35 = vld [vmem:[#allocation2 + $0x8] sm:$0xf]  ;;  %v917_v39 = vld [vmem:[#allocation2 + $0x28] sm:$0xf0]  ;;  %v925_v45 = vld [vmem:[#allocation2 + $0x30] sm:$0xf0] }
  0x1a   :  { %768 = vmatpush.bf16.msra.mxu1 %v1295_v13  ;;  %v1338_v37 = vld [vmem:[#allocation5 + $0x1b8] sm:$0xff]  ;;  %v924_v43 = vor.u32 %v1279_v36, %v923_v35  ;;  %v1321_v46 = vld [vmem:[#allocation5 + $0x130] sm:$0xff]  ;;  %v920_v47 = vor.u32 %v1273_v38, %v917_v39  ;;  %v1320_v52 = vld [vmem:[#allocation5 + $0x128] sm:$0xff] }
  0x1b   :  { %782 = vmatpush.bf16.msra.mxu2 %v1303_v14  ;;  %v1346_v42 = vld [vmem:[#allocation5 + $0x1f8] sm:$0xff]  ;;  %v1329_v48 = vld [vmem:[#allocation5 + $0x170] sm:$0xff]  ;;  %v1328_v53 = vld [vmem:[#allocation5 + $0x168] sm:$0xff] }
  0x1c   :  { %796 = vmatpush.bf16.msra.mxu3 %v1311_v15  ;;  %v1274_v44 = vld [vmem:[#allocation2 + $0xc] sm:$0xf]  ;;  %v1337_v49 = vld [vmem:[#allocation5 + $0x1b0] sm:$0xff]  ;;  %v1336_v54 = vld [vmem:[#allocation5 + $0x1a8] sm:$0xff] }
  0x1d   :  { %755 = vmatpush.bf16.msra.mxu0 %v1286_v16  ;;  %v928_v50 = vor.u32 %v1274_v44, %v925_v45  ;;  %v1345_v51 = vld [vmem:[#allocation5 + $0x1f0] sm:$0xff]  ;;  %v1344_v55 = vld [vmem:[#allocation5 + $0x1e8] sm:$0xff]  ;;  %v1319_v56 = vld [vmem:[#allocation5 + $0x120] sm:$0xff] }
  0x1e   :  { %769 = vmatpush.bf16.msra.mxu1 %v1294_v17  ;;  %v1327_v57 = vld [vmem:[#allocation5 + $0x160] sm:$0xff]  ;;  %v1318_v60 = vld [vmem:[#allocation5 + $0x118] sm:$0xff]  ;;  %v1317_v0 = vld [vmem:[#allocation5 + $0x110] sm:$0xff] }
  0x1f   :  { %783 = vmatpush.bf16.msra.mxu2 %v1302_v18  ;;  %v1335_v58 = vld [vmem:[#allocation5 + $0x1a0] sm:$0xff]  ;;  %v1326_v61 = vld [vmem:[#allocation5 + $0x158] sm:$0xff]  ;;  %v1325_v1 = vld [vmem:[#allocation5 + $0x150] sm:$0xff] }
  0x20   :  { %797 = vmatpush.bf16.msra.mxu3 %v1310_v19  ;;  %v1343_v59 = vld [vmem:[#allocation5 + $0x1e0] sm:$0xff]  ;;  %v1334_v62 = vld [vmem:[#allocation5 + $0x198] sm:$0xff]  ;;  %v1333_v2 = vld [vmem:[#allocation5 + $0x190] sm:$0xff] }
  0x21   :  { %756 = vmatpush.bf16.msra.mxu0 %v1285_v20  ;;  %v1342_v63 = vld [vmem:[#allocation5 + $0x1d8] sm:$0xff]  ;;  %v1341_v3 = vld [vmem:[#allocation5 + $0x1d0] sm:$0xff]  ;;  %v1316_v4 = vld [vmem:[#allocation5 + $0x108] sm:$0xff] }
  0x22   :  { %770 = vmatpush.bf16.msra.mxu1 %v1293_v21  ;;  %v1324_v5 = vld [vmem:[#allocation5 + $0x148] sm:$0xff]  ;;  %v1315_v8 = vld [vmem:[#allocation5 + $0x100] sm:$0xff]  ;;  %v1281_v14 = vld [vmem:[#allocation2 + $0x3c] sm:$0xf0] }
  0x23   :  { %784 = vmatpush.bf16.msra.mxu2 %v1301_v22  ;;  %v1332_v6 = vld [vmem:[#allocation5 + $0x188] sm:$0xff]  ;;  %v1323_v9 = vld [vmem:[#allocation5 + $0x140] sm:$0xff]  ;;  %v1354_v17 = vld [vmem:[#allocation5 + $0x238] sm:$0xff] }
  0x24   :  { %798 = vmatpush.bf16.msra.mxu3 %v1309_v23  ;;  %v1340_v7 = vld [vmem:[#allocation5 + $0x1c8] sm:$0xff]  ;;  %v1331_v10 = vld [vmem:[#allocation5 + $0x180] sm:$0xff]  ;;  %v1362_v18 = vld [vmem:[#allocation5 + $0x278] sm:$0xff] }
  0x25   :  { %757 = vmatpush.bf16.msra.mxu0 %v1284_v24  ;;  %v931_v11 = vld [vmem:[#allocation2 + $0x10] sm:$0xf]  ;;  %v1280_v12 = vld [vmem:[#allocation2 + $0x34] sm:$0xf0]  ;;  %v1275_v15 = vld [vmem:[#allocation2 + $0x14] sm:$0xf] }
  0x26   :  { %771 = vmatpush.bf16.msra.mxu1 %v1292_v25  ;;  %v939_v13 = vld [vmem:[#allocation2 + $0x18] sm:$0xf]  ;;  %v933_v16 = vld [vmem:[#allocation2 + $0x38] sm:$0xf0]  ;;  %v1339_v19 = vld [vmem:[#allocation5 + $0x1c0] sm:$0xff]  ;;  %v932_v20 = vor.u32 %v1280_v12, %v931_v11 }
  0x27   :  { %785 = vmatpush.bf16.msra.mxu2 %v1300_v26  ;;  %v1276_v21 = vld [vmem:[#allocation2 + $0x1c] sm:$0xf]  ;;  %v941_v22 = vld [vmem:[#allocation2 + $0x40] sm:$0xf0]  ;;  %v940_v23 = vor.u32 %v1281_v14, %v939_v13  ;;  %v936_v24 = vor.u32 %v1275_v15, %v933_v16  ;;  %v1350_v32 = vld [vmem:[#allocation5 + $0x218] sm:$0xff] }
  0x28   :  { %799 = vmatpush.bf16.msra.mxu3 %v1308_v27  ;;  %v944_v25 = vor.u32 %v1276_v21, %v941_v22  ;;  %v1353_v26 = vld [vmem:[#allocation5 + $0x230] sm:$0xff]  ;;  %v1358_v33 = vld [vmem:[#allocation5 + $0x258] sm:$0xff]  ;;  %v1348_v36 = vld [vmem:[#allocation5 + $0x208] sm:$0xff] }
  0x29   :  { %758 = vmatpush.bf16.msra.mxu0 %v1283_v28  ;;  %v1361_v27 = vld [vmem:[#allocation5 + $0x270] sm:$0xff]  ;;  %v1352_v28 = vld [vmem:[#allocation5 + $0x228] sm:$0xff]  ;;  %v1347_v38 = vld [vmem:[#allocation5 + $0x200] sm:$0xff] }
  0x2a   :  { %772 = vmatpush.bf16.msra.mxu1 %v1291_v29  ;;  %v1360_v29 = vld [vmem:[#allocation5 + $0x268] sm:$0xff]  ;;  %v1357_v35 = vld [vmem:[#allocation5 + $0x250] sm:$0xff] }
  0x2b   :  { %786 = vmatpush.bf16.msra.mxu2 %v1299_v30  ;;  %v1351_v30 = vld [vmem:[#allocation5 + $0x220] sm:$0xff]  ;;  %v947_v39 = vld [vmem:[#allocation2 + $0x20] sm:$0xf] }
  0x2c   :  { %800 = vmatpush.bf16.msra.mxu3 %v1307_v40  ;;  %759 = vmatmul.bf16.vlgmr.msra.gmra.mxu0 %v916_v41  ;;  %v1282_v40 = vld [vmem:[#allocation2 + $0x44] sm:$0xf0]  ;;  %v1355_v41 = vld [vmem:[#allocation5 + $0x240] sm:$0xff] }
  0x2d   :  { %807 = vmatpush.bf16.msrb.mxu0 %v1322_v31  ;;  %773 = vmatmul.bf16.vlgmr.msra.gmra.mxu1 %v920_v47  ;;  %v1359_v31 = vld [vmem:[#allocation5 + $0x260] sm:$0xff]  ;;  %v948_v44 = vor.u32 %v1282_v40, %v947_v39 }
  0x2e   :  { %821 = vmatpush.bf16.msrb.mxu1 %v1330_v34  ;;  %787 = vmatmul.bf16.vlgmr.msra.gmra.mxu2 %v924_v43  ;;  %v1349_v34 = vld [vmem:[#allocation5 + $0x210] sm:$0xff]  ;;  %v949_v43 = vld [vmem:[#allocation2 + $0x48] sm:$0xf0] }
  0x2f   :  { %835 = vmatpush.bf16.msrb.mxu2 %v1338_v37  ;;  %801 = vmatmul.bf16.vlgmr.msra.gmra.mxu3 %v928_v50  ;;  %v1356_v37 = vld [vmem:[#allocation5 + $0x248] sm:$0xff] }
  0x30   :  { %849 = vmatpush.bf16.msrb.mxu3 %v1346_v42  ;;  %v1277_v42 = vld [vmem:[#allocation2 + $0x24] sm:$0xf] }
  0x31   :  { %808 = vmatpush.bf16.msrb.mxu0 %v1321_v46  ;;  %v952_v45 = vor.u32 %v1277_v42, %v949_v43 }
  0x32   :  { %822 = vmatpush.bf16.msrb.mxu1 %v1329_v48  ;;  %v1372_v48 = vld [vmem:[%s1494_s2] ss:$0 sm:$0xff]  ;;  %s1457_s2 = smov [#allocation7]  }
  0x33   :  { %836 = vmatpush.bf16.msrb.mxu2 %v1337_v49  ;;  %s897_s26 = sshll.u32 %s1457_s2, 4  ;;  %s898_s26 = int_to_ptr.vmem [resolvable:$true] %s897_s26 }
  0x34   :  { %850 = vmatpush.bf16.msrb.mxu3 %v1345_v51 }
  0x35   :  { %809 = vmatpush.bf16.msrb.mxu0 %v1320_v52 }
  0x36   :  { %823 = vmatpush.bf16.msrb.mxu1 %v1328_v53 }
  0x37   :  { %837 = vmatpush.bf16.msrb.mxu2 %v1336_v54 }
  0x38   :  { %851 = vmatpush.bf16.msrb.mxu3 %v1344_v55 }
  0x39   :  { %810 = vmatpush.bf16.msrb.mxu0 %v1319_v56 }
  0x3a   :  { %824 = vmatpush.bf16.msrb.mxu1 %v1327_v57 }
  0x3b   :  { %838 = vmatpush.bf16.msrb.mxu2 %v1335_v58 }
  0x3c   :  { %852 = vmatpush.bf16.msrb.mxu3 %v1343_v59 }
  0x3d   :  { %811 = vmatpush.bf16.msrb.mxu0 %v1318_v60 }
  0x3e   :  { %825 = vmatpush.bf16.msrb.mxu1 %v1326_v61 }
  0x3f   :  { %839 = vmatpush.bf16.msrb.mxu2 %v1334_v62 }
  0x40   :  { %853 = vmatpush.bf16.msrb.mxu3 %v1342_v63 }
  0x41   :  { %812 = vmatpush.bf16.msrb.mxu0 %v1317_v0 }
  0x42   :  { %826 = vmatpush.bf16.msrb.mxu1 %v1325_v1 }
  0x43   :  { %840 = vmatpush.bf16.msrb.mxu2 %v1333_v2 }
  0x44   :  { %854 = vmatpush.bf16.msrb.mxu3 %v1341_v3 }
  0x45   :  { %813 = vmatpush.bf16.msrb.mxu0 %v1316_v4 }
  0x46   :  { %827 = vmatpush.bf16.msrb.mxu1 %v1324_v5 }
  0x47   :  { %841 = vmatpush.bf16.msrb.mxu2 %v1332_v6 }
  0x48   :  { %855 = vmatpush.bf16.msrb.mxu3 %v1340_v7 }
  0x49   :  { %814 = vmatpush.bf16.msrb.mxu0 %v1315_v8 }
  0x4a   :  { %828 = vmatpush.bf16.msrb.mxu1 %v1323_v9 }
  0x4b   :  { %842 = vmatpush.bf16.msrb.mxu2 %v1331_v10 }
  0x4c   :  { %856 = vmatpush.bf16.msrb.mxu3 %v1339_v19  ;;  %815 = vmatmul.bf16.vlgmr.msrb.gmra.mxu0 %v932_v20 }
  0x4d   :  { %863 = vmatpush.bf16.msra.mxu0 %v1354_v17  ;;  %829 = vmatmul.bf16.vlgmr.msrb.gmra.mxu1 %v936_v24 }
  0x4e   :  { %877 = vmatpush.bf16.msra.mxu1 %v1362_v18  ;;  %843 = vmatmul.bf16.vlgmr.msrb.gmra.mxu2 %v940_v23 }
  0x4f   :  { %857 = vmatmul.bf16.vlgmr.msrb.gmra.mxu3 %v944_v25 }
  0x51   :  { %864 = vmatpush.bf16.msra.mxu0 %v1353_v26 }
  0x52   :  { %878 = vmatpush.bf16.msra.mxu1 %v1361_v27 }
  0x55   :  { %865 = vmatpush.bf16.msra.mxu0 %v1352_v28 }
  0x56   :  { %879 = vmatpush.bf16.msra.mxu1 %v1360_v29 }
  0x59   :  { %866 = vmatpush.bf16.msra.mxu0 %v1351_v30 }
  0x5a   :  { %880 = vmatpush.bf16.msra.mxu1 %v1359_v31 }
  0x5d   :  { %867 = vmatpush.bf16.msra.mxu0 %v1350_v32 }
  0x5e   :  { %881 = vmatpush.bf16.msra.mxu1 %v1358_v33 }
  0x61   :  { %868 = vmatpush.bf16.msra.mxu0 %v1349_v34 }
  0x62   :  { %882 = vmatpush.bf16.msra.mxu1 %v1357_v35 }
  0x65   :  { %869 = vmatpush.bf16.msra.mxu0 %v1348_v36 }
  0x66   :  { %883 = vmatpush.bf16.msra.mxu1 %v1356_v37 }
  0x69   :  { %870 = vmatpush.bf16.msra.mxu0 %v1347_v38 }
  0x6a   :  { %884 = vmatpush.bf16.msra.mxu1 %v1355_v41 }
  0x6c   :  { %871 = vmatmul.bf16.vlgmr.msra.gmra.mxu0 %v948_v44 }
  0x6d   :  { %885 = vmatmul.bf16.vlgmr.msra.gmra.mxu1 %v952_v45 }
  0xa9   :  { %v760_v46 = vpop.f32.mrf.mxu0 }
  0xaa   :  { %v774_v47 = vpop.f32.mrf.mxu1  ;;  %v761_v50 = vadd.f32 %v1372_v48, %v760_v46 }
  0xac   :  { %v775_v54 = vadd.f32 %v774_v47, %v761_v50 }
  0xb1   :  { %v788_v49 = vpop.f32.mrf.mxu2  ;;  %v762_v51 = vpop.f32.mrf.mxu0 }
  0xb2   :  { %v776_v52 = vpop.f32.mrf.mxu1  ;;  %v802_v53 = vpop.f32.mrf.mxu3  ;;  %v789_v55 = vadd.f32 %v788_v49, %v775_v54  ;;  %v763_v58 = vadd.f32 %v1372_v48, %v762_v51 }
  0xb4   :  { %v803_v59 = vadd.f32 %v802_v53, %v789_v55  ;;  %v777_v62 = vadd.f32 %v776_v52, %v763_v58 }
  0xb9   :  { %v790_v56 = vpop.f32.mrf.mxu2 }
  0xba   :  { %v804_v61 = vpop.f32.mrf.mxu3  ;;  %v791_v1 = vadd.f32 %v790_v56, %v777_v62 }
  0xbc   :  { %v805_v6 = vadd.f32 %v804_v61, %v791_v1 }
  0xc9   :  { %v816_v57 = vpop.f32.mrf.mxu0 }
  0xca   :  { %v830_v60 = vpop.f32.mrf.mxu1  ;;  %v817_v63 = vadd.f32 %v816_v57, %v803_v59 }
  0xcc   :  { %v831_v2 = vadd.f32 %v830_v60, %v817_v63 }
  0xd1   :  { %v844_v0 = vpop.f32.mrf.mxu2  ;;  %v818_v3 = vpop.f32.mrf.mxu0 }
  0xd2   :  { %v832_v4 = vpop.f32.mrf.mxu1  ;;  %v858_v5 = vpop.f32.mrf.mxu3  ;;  %v845_v7 = vadd.f32 %v844_v0, %v831_v2  ;;  %v819_v8 = vadd.f32 %v818_v3, %v805_v6 }
  0xd4   :  { %v859_v9 = vadd.f32 %v858_v5, %v845_v7  ;;  %v833_v12 = vadd.f32 %v832_v4, %v819_v8 }
  0xd9   :  { %v846_v10 = vpop.f32.mrf.mxu2 }
  0xda   :  { %v847_v15 = vadd.f32 %v846_v10, %v833_v12  ;;  %v860_v17 = vpop.f32.mrf.mxu3 }
  0xdc   :  { %v861_v18 = vadd.f32 %v860_v17, %v847_v15 }
  0xe9   :  { %v872_v11 = vpop.f32.mrf.mxu0 }
  0xea   :  { %v873_v13 = vadd.f32 %v872_v11, %v859_v9  ;;  %v886_v14 = vpop.f32.mrf.mxu1 }
  0xec   :  { %v887_v16 = vadd.f32 %v886_v14, %v873_v13 }
  0xee   :  { %891 = vst [vmem:[#allocation7] sm:$0xff] %v887_v16 }
  0xf1   :  { %v874_v19 = vpop.f32.mrf.mxu0 }
  0xf2   :  { %v875_v20 = vadd.f32 %v874_v19, %v861_v18  ;;  %v888_v21 = vpop.f32.mrf.mxu1 }
  0xf4   :  { %v889_v22 = vadd.f32 %v888_v21, %v875_v20 }
  0xf6   :  { %892 = vst [vmem:[#allocation7 + $0x8] sm:$0xff] %v889_v22 }
  0xf7   :  { %905 = dma.vmem_to_hbm [thread:$0]  %s898_s26, 256, %s900_s29, [#allocation4], %s1458_s30, %s1458_s30, %s1459_s4  }
  0xf8   :  { %1449 = dma.done.wait [#allocation4], 256  }
  0xf9   :  { %1450 = vsyncadd [#allocation4], 4294967040 }
  0xfa   :  { %910 = vsyncpa [#allocation3], 1 }
  0xfb   :  { %911 = vsyncpa [#allocation6], 1 }
  0xfc   :  { %912 = vsyncpa [#allocation4], 1 }

</bundles_post_ra>
